<compile_context>
chip_gen: v7x
topology: tpu7x:2x2x1
jax: 0.10.0
libtpu: 0.0.40
codegen_flags: <defaults>
</compile_context>

<pallas_src>
import jax
import jax.numpy as jnp
from jax import lax
from jax.experimental import pallas as pl
from jax.experimental.pallas import tpu as pltpu

HIDDEN = 64  # fixed inner width from the module definition


def _labelpredictor_kernel(x_ref, w_ref, o_ref):
    # x_ref: [TB, dim_in], w_ref: [dim_out, dim_in] (PyTorch layout).
    # Contract the feature (K) axis of both operands on the MXU; no logical
    # transpose is ever materialized.
    o_ref[...] = lax.dot_general(
        x_ref[...],
        w_ref[...],
        dimension_numbers=(((1,), (1,)), ((), ())),
        preferred_element_type=jnp.float32,
    ).astype(o_ref.dtype)


def _pick_batch_tile(batch, max_tile=2048):
    """Largest tile <= max_tile that is a multiple of 8 and divides batch
    (or the full batch if it is small / has no such divisor)."""
    if batch <= max_tile:
        return batch
    tb = (max_tile // 8) * 8
    while tb >= 8:
        if batch % tb == 0:
            return tb
        tb -= 8
    return batch  # fall back to a single full-batch block


def labelpredictor_forward(features, w1, w2, *, max_tile=2048):
    """features: [B, dim_in]; w1: [64, dim_in]; w2: [dim_out, 64] (PyTorch layouts)."""
    B, dim_in = features.shape
    dim_out = w2.shape[0]

    # Fuse the two bias-free linears into one weight matrix, kept in
    # PyTorch ([out, in]) layout so no transpose op is emitted.
    w_fused = jnp.dot(w2, w1, preferred_element_type=jnp.float32).astype(
        features.dtype
    )  # [dim_out, dim_in]

    tb = _pick_batch_tile(B, max_tile)
    grid = (B // tb,)

    return pl.pallas_call(
        _labelpredictor_kernel,
        out_shape=jax.ShapeDtypeStruct((B, dim_out), features.dtype),
        grid_spec=pltpu.PrefetchScalarGridSpec(
            num_scalar_prefetch=0,
            grid=grid,
            in_specs=[
                # Batch tile of the activations (pipelined across the grid).
                pl.BlockSpec((tb, dim_in), lambda i: (i, 0)),
                # Fused weight: same block every step -> stays VMEM-resident.
                pl.BlockSpec((dim_out, dim_in), lambda i: (0, 0)),
            ],
            out_specs=pl.BlockSpec((tb, dim_out), lambda i: (i, 0)),
        ),
        compiler_params=pltpu.CompilerParams(
            # Batch tiles are independent -> pipeline + megacore sharding (v7x).
            dimension_semantics=("parallel",),
        ),
    )(features, w_fused)


if __name__ == "__main__":
    # Small shapes consistent with the module: batch=8, dim_in=32, dim_out=16.
    B, DIM_IN, DIM_OUT = 8, 32, 16

    key = jax.random.PRNGKey(0)
    k_x, k_w1, k_w2 = jax.random.split(key, 3)

    features = jax.random.normal(k_x, (B, DIM_IN), dtype=jnp.float32)
    bound1 = 1.0 / (DIM_IN ** 0.5)
    bound2 = 1.0 / (HIDDEN ** 0.5)
    w1 = jax.random.uniform(k_w1, (HIDDEN, DIM_IN), jnp.float32, -bound1, bound1)
    w2 = jax.random.uniform(k_w2, (DIM_OUT, HIDDEN), jnp.float32, -bound2, bound2)

    out = labelpredictor_forward(features, w1, w2)
    out = jax.block_until_ready(out)

    # Reference: plain JAX version of the PyTorch forward (unfused).
    ref = (features @ w1.T) @ w2.T
    assert out.shape == (B, DIM_OUT)
    # Fusion only changes f32 accumulation order; allow a tiny tolerance.
    assert jnp.allclose(out, ref, atol=1e-4, rtol=1e-5)

    print("KERNEL_OK")
</pallas_src>

<mosaic_0001>
module attributes {stable_mosaic.version = 11 : i64} {
  func.func @_labelpredictor_kernel(%arg0: i32, %arg1: memref<8x32xf32, #tpu.memory_space<vmem>>, %arg2: memref<16x32xf32, #tpu.memory_space<vmem>>, %arg3: memref<8x16xf32, #tpu.memory_space<vmem>>) attributes {dimension_semantics = [#tpu.dimension_semantics<parallel>], iteration_bounds = array<i64: 1>, scalar_prefetch = 0 : i64, scratch_operands = 0 : i64, tpu.core_type = #tpu.core_type<tc>, window_params = [{transform_indices = @transform_0, window_bounds = array<i64: 8, 32>}, {pipeline_mode = #tpu.pipeline_mode<synchronous>, transform_indices = @transform_1, window_bounds = array<i64: 16, 32>}, {transform_indices = @transform_2, window_bounds = array<i64: 8, 16>}]} {
    %c0 = arith.constant 0 : index
    %c0_0 = arith.constant 0 : index
    %0 = vector.load %arg1[%c0, %c0_0] : memref<8x32xf32, #tpu.memory_space<vmem>>, vector<8x32xf32>
    %c0_1 = arith.constant 0 : index
    %c0_2 = arith.constant 0 : index
    %1 = vector.load %arg2[%c0_1, %c0_2] : memref<16x32xf32, #tpu.memory_space<vmem>>, vector<16x32xf32>
    %cst = arith.constant dense<0.000000e+00> : vector<8x16xf32>
    %2 = tpu.matmul %0, %1, %cst {dimension_numbers = #tpu.dot_dimension_numbers<[1], [1], [0], [0], [0, 0, 1, 0], [], []>} : vector<8x32xf32>, vector<16x32xf32>, vector<8x16xf32> -> vector<8x16xf32>
    %c0_3 = arith.constant 0 : index
    %c0_4 = arith.constant 0 : index
    %3 = vector.load %arg3[%c0_3, %c0_4] : memref<8x16xf32, #tpu.memory_space<vmem>>, vector<8x16xf32>
    tpu.vector_store %arg3[%c0_3, %c0_4], %2 {strides = array<i32>} : memref<8x16xf32, #tpu.memory_space<vmem>>, vector<8x16xf32>,
    return
  }
  func.func @transform_0(%arg0: i32) -> (i32, i32) {
    %c0_i32 = arith.constant 0 : i32
    %c0_i32_0 = arith.constant 0 : i32
    return %arg0, %c0_i32 : i32, i32
  }
  func.func @transform_1(%arg0: i32) -> (i32, i32) {
    %c0_i32 = arith.constant 0 : i32
    %c0_i32_0 = arith.constant 0 : i32
    %c0_i32_1 = arith.constant 0 : i32
    return %c0_i32, %c0_i32_0 : i32, i32
  }
  func.func @transform_2(%arg0: i32) -> (i32, i32) {
    %c0_i32 = arith.constant 0 : i32
    %c0_i32_0 = arith.constant 0 : i32
    return %arg0, %c0_i32 : i32, i32
  }
}

</mosaic_0001>

<bundles_post_ra>
// kernel: tpu_custom_call.1
= control target key start
LH: loop header
LB: loop body
LE: loop exit
PB: predicated region body
PF: predicated region fallthrough
CT: control target
= control target key end

     0   :  { %7 = vsyncpa [#allocation3], 0  ;;  %s302_s0 = inlined_call_operand.hbm [shape: f32[8,32], index: 0, kind: input, shape index: {}]   ;;  %s303_s1 = inlined_call_operand.hbm [shape: f32[16,32], index: 1, kind: input, shape index: {}]   ;;  %s304_s2 = inlined_call_operand.hbm [shape: f32[8,16], index: 2, kind: output, shape index: {}]  }
   0x1   :  { %8 = vsyncpa [#allocation6], 0 }
   0x2   :  { %9 = vsyncpa [#allocation4], 0  ;;  %s236_s9 = smov [#allocation2]   ;;  %s237_s11 = smov [#allocation5]  }
   0x3   :  { %s16_s10 = sshll.u32 %s236_s9, 4  ;;  %s25_s12 = sshll.u32 %s237_s11, 4  ;;  %s17_s10 = int_to_ptr.vmem [resolvable:$true] %s16_s10  ;;  %s259_s12 = int_to_ptr.vmem [resolvable:$true] %s25_s12 }
   0x4   :  { %s164_s15 = scalar_lea.hbm %s302_s0, 128 }
   0x5   :  { %p165_p0 = scmp.ne.s32.totalorder %s302_s0, %s164_s15  ;;  %p168_p1 = scmp.lt.u32.totalorder %s164_s15, %s302_s0 }
   0x7   :  { %p170_p2 = pnand %p168_p1, %p165_p0 }
   0x9   :  { %173 = shalt.err (!%p170_p2)
}
   0xa   :  { %s174_s20 = scalar_lea.vmem %s17_s10, 128  ;;  %p179_p4 = scmp.lt.s32.totalorder %s17_s10, %s17_s10 }
   0xb   :  { %p175_p3 = scmp.ne.s32.totalorder %s17_s10, %s174_s20  ;;  %p180_p5 = scmp.lt.s32.totalorder %s174_s20, %s174_s20 }
   0xd   :  { %p181_p6 = por %p180_p5, %p179_p4 }
   0xf   :  { %p182_p7 = pnand %p181_p6, %p175_p3 }
  0x11   :  { %185 = shalt.err (!%p182_p7)
}
  0x12   :  { %19 = dma.hbm_to_vmem [thread:$0]  %s302_s0, 128, %s17_s10, [#allocation3]  }
  0x13   :  { %s186_s25 = scalar_lea.hbm %s303_s1, 256 }
  0x14   :  { %p187_p8 = scmp.ne.s32.totalorder %s303_s1, %s186_s25  ;;  %p190_p9 = scmp.lt.u32.totalorder %s186_s25, %s303_s1 }
  0x16   :  { %p192_p10 = pnand %p190_p9, %p187_p8 }
  0x18   :  { %195 = shalt.err (!%p192_p10)
}
  0x19   :  { %s196_s30 = scalar_lea.vmem %s259_s12, 256  ;;  %p201_p12 = scmp.lt.s32.totalorder %s259_s12, %s259_s12 }
  0x1a   :  { %p197_p11 = scmp.ne.s32.totalorder %s259_s12, %s196_s30  ;;  %p202_p13 = scmp.lt.s32.totalorder %s196_s30, %s196_s30 }
  0x1c   :  { %p203_p0 = por %p202_p13, %p201_p12 }
  0x1e   :  { %p204_p1 = pnand %p203_p0, %p197_p11 }
  0x20   :  { %207 = shalt.err (!%p204_p1)
}
  0x21   :  { %s238_s0 = smov 128   ;;  %s239_s3 = smov 8  }
  0x22   :  { %31 = dma.hbm_to_vmem [thread:$0]  %s303_s1, 256, %s259_s12, [#allocation6], %s238_s0, %s238_s0, %s239_s3  }
  0x23   :  { %230 = dma.done.wait [#allocation3], 128  }
  0x24   :  { %231 = vsyncadd [#allocation3], 4294967168 }
  0x25   :  { %232 = dma.done.wait [#allocation6], 256  }
  0x26   :  { %233 = vsyncadd [#allocation6], 4294967040  ;;  %v240_v0 = vmov 0.0|0.0   ;;  %vm241_vm0 = vmmov 0   ;;  %v242_v1 = vmov 0.0   ;;  %vm41_vm1 = vcmask 261120  }
  0x27   :  { %152 = vmatprep.subr.bf16.mxu0 %v240_v0  ;;  %149 = vmatprep.mubr.msk.f32.mxu0 %vm241_vm0, %v242_v1  ;;  %v39_v2 = vld [vmem:[#allocation5] sm:$0xff]  ;;  %v40_v3 = vld [vmem:[#allocation5 + $0x8] sm:$0xff]  ;;  %vm154_vm2 = vmpackc.low %vm41_vm1, %vm41_vm1  ;;  %s243_s6 = smov [#allocation7]   ;;  %vm121_vm3 = vcmask 130048  }
  0x28   :  { %v153_v4 = vpack.c.bf16 %v40_v3, %v39_v2  ;;  %v38_v5 = vld [vmem:[#allocation2] sm:$0xff]  ;;  %s129_s7 = sshll.u32 %s243_s6, 4  ;;  %s130_s7 = int_to_ptr.vmem [resolvable:$true] %s129_s7 }
  0x29   :  { %s208_s1 = scalar_lea.vmem %s130_s7, 128  ;;  %p213_p3 = scmp.lt.s32.totalorder %s130_s7, %s130_s7 }
  0x2a   :  { %155 = vmatpush3.bf16.xpose.msk.msra.mxu0 %vm154_vm2, %v153_v4  ;;  %p209_p2 = scmp.ne.s32.totalorder %s130_s7, %s208_s1  ;;  %p214_p4 = scmp.lt.s32.totalorder %s208_s1, %s208_s1 }
  0x2c   :  { %p215_p5 = por %p214_p4, %p213_p3 }
  0x2e   :  { %p216_p6 = pnand %p215_p5, %p209_p2 }
  0x31   :  { %150 = vmatmul.mubr.msk.f32.vlgmr.msra.gmra.mrb[0].mxu0 %vm41_vm1, %v38_v5 }
 0x104   :  { %v117_v6 = vpop.f32.mrb[0].mxu0 }
 0x105   :  { %v151_v7 = vpop.f32.mrb[1].mxu0  ;;  %122 = vst.msk [vmem:[#allocation7] sm:$0xff] %vm121_vm3, %v117_v6 }
 0x106   :  { %219 = shalt.err (!%p216_p6)
}
 0x107   :  { %s220_s10 = scalar_lea.hbm %s304_s2, 128 }
 0x108   :  { %p221_p7 = scmp.ne.s32.totalorder %s304_s2, %s220_s10  ;;  %p224_p8 = scmp.lt.u32.totalorder %s220_s10, %s304_s2 }
 0x10a   :  { %p226_p9 = pnand %p224_p8, %p221_p7 }
 0x10c   :  { %229 = shalt.err (!%p226_p9)
}
 0x10d   :  { %132 = dma.vmem_to_hbm [thread:$0]  %s130_s7, 128, %s304_s2, [#allocation4]  }
 0x10e   :  { %234 = dma.done.wait [#allocation4], 128  }
 0x10f   :  { %235 = vsyncadd [#allocation4], 4294967168 }
 0x110   :  { %136 = vsyncpa [#allocation3], 1 }
 0x111   :  { %137 = vsyncpa [#allocation6], 1 }
 0x112   :  { %138 = vsyncpa [#allocation4], 1 }

</bundles_post_ra>
